<compile_context>
chip_gen: v6e
topology: v6e:2x2x1
jax: 0.10.0
libtpu: 0.0.40
codegen_flags: <defaults>
</compile_context>

<pallas_src>
import jax
import jax.numpy as jnp
from jax.experimental import pallas as pl
from jax.experimental.pallas import tpu as pltpu

LANES = 128                       # lane width of a vreg
MAX_TILE_ROWS = 8192              # 8192*128*4B = 4 MiB per buffer per grid step
VMEM_LIMIT_BYTES = 32 * 1024 * 1024  # 3 arrays x 2 bufs x 4 MiB = 24 MiB fits


def _policy_kernel(wb_ref, x_ref, mu_ref, logstd_ref):
    # wb_ref:  SMEM (4,) f32  = [w_mu, w_logstd, b_mu, b_logstd]
    # x_ref / mu_ref / logstd_ref: VMEM (tile_r, 128) f32 tiles
    x = x_ref[...]
    # Affine transform on the VPU; SMEM scalars fold into the broadcast.
    mu_ref[...] = x * wb_ref[0] + wb_ref[2]
    logstd_ref[...] = x * wb_ref[1] + wb_ref[3]


def _choose_tile_rows(r):
    """Rows per grid step: as big as possible (amortize per-step pipeline
    overhead) while keeping >=2 grid steps for megacore sharding (v7x)."""
    if r < 16:
        return r                                  # single block == full array
    tile = min(MAX_TILE_ROWS, (r // 2 // 8) * 8)  # multiple of 8, >=2 steps
    return max(tile, 8)


def _policy_main(x_main, wb):
    """Run the kernel on a lane-dense (r, 128) f32 slab."""
    r = x_main.shape[0]
    tile_r = _choose_tile_rows(r)
    grid_r = pl.cdiv(r, tile_r)   # partial last block handled by Pallas

    out_shape = (
        jax.ShapeDtypeStruct((r, LANES), jnp.float32),
        jax.ShapeDtypeStruct((r, LANES), jnp.float32),
    )

    return pl.pallas_call(
        _policy_kernel,
        out_shape=out_shape,
        grid_spec=pltpu.PrefetchScalarGridSpec(
            num_scalar_prefetch=0,
            grid=(grid_r,),
            in_specs=[
                pl.BlockSpec(memory_space=pltpu.MemorySpace.SMEM),  # wb scalars
                pl.BlockSpec((tile_r, LANES), lambda i: (i, 0)),    # x tiles
            ],
            out_specs=[
                pl.BlockSpec((tile_r, LANES), lambda i: (i, 0)),    # mu
                pl.BlockSpec((tile_r, LANES), lambda i: (i, 0)),    # log_std
            ],
        ),
        compiler_params=pltpu.CompilerParams(
            dimension_semantics=("parallel",),       # shards across TCs on v7x
            vmem_limit_bytes=VMEM_LIMIT_BYTES,       # large tiles OK on v5e too
        ),
        cost_estimate=pl.CostEstimate(
            flops=4 * r * LANES,                     # 2 fused mul-adds / elem
            transcendentals=0,
            bytes_accessed=3 * r * LANES * 4,        # 1 read + 2 writes
        ),
        # mu reuses the x buffer (same shape/dtype/index_map); true in-place
        # when x is an intermediate, XLA copy-inserts otherwise (still correct).
        input_output_aliases={1: 0},
    )(wb, x_main)


def policy_forward(x, weight, bias):
    """x: (B, 1); weight: (2, 1); bias: (2,) -> (mu, log_std), each (B, 1)."""
    B = x.shape[0]
    x = x.astype(jnp.float32)
    weight = weight.astype(jnp.float32)
    bias = bias.astype(jnp.float32)

    w_mu, w_ls = weight[0, 0], weight[1, 0]
    b_mu, b_ls = bias[0], bias[1]

    n = B * x.shape[1]                 # in_features == 1 -> n == B
    n_main = (n // LANES) * LANES      # 128-aligned prefix length

    if n_main == 0:
        # Less than one lane row: a kernel launch is pure overhead.
        return x * w_mu + b_mu, x * w_ls + b_ls

    # [w_mu, w_logstd, b_mu, b_logstd] as SMEM scalars
    wb = jnp.stack([w_mu, w_ls, b_mu, b_ls])

    if n_main == n:
        # Aligned fast path: zero-copy relayout (contiguous reshape) both ways.
        x_main = x.reshape(n_main // LANES, LANES)
        mu_main, ls_main = _policy_main(x_main, wb)
        return mu_main.reshape(B, 1), ls_main.reshape(B, 1)

    # Unaligned: kernel on the 128-aligned prefix, tiny (<128 elem) tail in JAX.
    x_flat = x.reshape(-1)
    x_main = x_flat[:n_main].reshape(n_main // LANES, LANES)
    x_tail = x_flat[n_main:]
    mu_main, ls_main = _policy_main(x_main, wb)
    mu = jnp.concatenate([mu_main.reshape(-1), x_tail * w_mu + b_mu]).reshape(B, 1)
    ls = jnp.concatenate([ls_main.reshape(-1), x_tail * w_ls + b_ls]).reshape(B, 1)
    return mu, ls


if __name__ == "__main__":
    key = jax.random.PRNGKey(0)
    k_x, k_w, k_b = jax.random.split(key, 3)

    # nn.Linear(1, 2) style init: U(-1/sqrt(fan_in), 1/sqrt(fan_in)), fan_in = 1
    weight = jax.random.uniform(k_w, (2, 1), jnp.float32, -1.0, 1.0)
    bias = jax.random.uniform(k_b, (2,), jnp.float32, -1.0, 1.0)

    fwd = jax.jit(policy_forward)

    ok = True
    # B=256 exercises the aligned zero-copy kernel path,
    # B=300 exercises kernel-on-prefix + plain-JAX tail.
    for B in (256, 300):
        x = jax.random.normal(jax.random.fold_in(k_x, B), (B, 1), dtype=jnp.float32)
        mu, log_std = fwd(x, weight, bias)
        jax.block_until_ready((mu, log_std))

        # Plain-JAX reference check
        y_ref = x @ weight.T + bias
        ok = ok and bool(jnp.allclose(mu, y_ref[:, 0:1], atol=1e-5))
        ok = ok and bool(jnp.allclose(log_std, y_ref[:, 1:2], atol=1e-5))

    assert ok, "mismatch vs plain-JAX reference"
    print("KERNEL_OK")
</pallas_src>

<mosaic_0001>
module attributes {stable_mosaic.version = 11 : i64} {
  func.func @_policy_kernel(%arg0: i32, %arg1: memref<4xf32, #tpu.memory_space<smem>>, %arg2: memref<2x128xf32, #tpu.memory_space<vmem>>, %arg3: memref<2x128xf32, #tpu.memory_space<vmem>>, %arg4: memref<2x128xf32, #tpu.memory_space<vmem>>) attributes {dimension_semantics = [#tpu.dimension_semantics<parallel>], iteration_bounds = array<i64: 1>, scalar_prefetch = 0 : i64, scratch_operands = 0 : i64, tpu.core_type = #tpu.core_type<tc>, window_params = [{transform_indices = @transform_0, window_bounds = array<i64: 4>}, {transform_indices = @transform_1, window_bounds = array<i64: 2, 128>}, {transform_indices = @transform_2, window_bounds = array<i64: 2, 128>}, {transform_indices = @transform_3, window_bounds = array<i64: 2, 128>}]} {
    %c0 = arith.constant 0 : index
    %c0_0 = arith.constant 0 : index
    %0 = vector.load %arg2[%c0, %c0_0] : memref<2x128xf32, #tpu.memory_space<vmem>>, vector<2x128xf32>
    %c0_1 = arith.constant 0 : index
    %1 = memref.load %arg1[%c0_1] : memref<4xf32, #tpu.memory_space<smem>>
    %2 = vector.broadcast %1 : f32 to vector<2x128xf32>
    %3 = arith.mulf %0, %2 : vector<2x128xf32>
    %c2 = arith.constant 2 : index
    %4 = memref.load %arg1[%c2] : memref<4xf32, #tpu.memory_space<smem>>
    %5 = vector.broadcast %4 : f32 to vector<2x128xf32>
    %6 = arith.addf %3, %5 : vector<2x128xf32>
    %c0_2 = arith.constant 0 : index
    %c0_3 = arith.constant 0 : index
    %7 = vector.load %arg3[%c0_2, %c0_3] : memref<2x128xf32, #tpu.memory_space<vmem>>, vector<2x128xf32>
    tpu.vector_store %arg3[%c0_2, %c0_3], %6 {strides = array<i32>} : memref<2x128xf32, #tpu.memory_space<vmem>>, vector<2x128xf32>,
    %c1 = arith.constant 1 : index
    %8 = memref.load %arg1[%c1] : memref<4xf32, #tpu.memory_space<smem>>
    %9 = vector.broadcast %8 : f32 to vector<2x128xf32>
    %10 = arith.mulf %0, %9 : vector<2x128xf32>
    %c3 = arith.constant 3 : index
    %11 = memref.load %arg1[%c3] : memref<4xf32, #tpu.memory_space<smem>>
    %12 = vector.broadcast %11 : f32 to vector<2x128xf32>
    %13 = arith.addf %10, %12 : vector<2x128xf32>
    %c0_4 = arith.constant 0 : index
    %c0_5 = arith.constant 0 : index
    %14 = vector.load %arg4[%c0_4, %c0_5] : memref<2x128xf32, #tpu.memory_space<vmem>>, vector<2x128xf32>
    tpu.vector_store %arg4[%c0_4, %c0_5], %13 {strides = array<i32>} : memref<2x128xf32, #tpu.memory_space<vmem>>, vector<2x128xf32>,
    return
  }
  func.func @transform_0(%arg0: i32) -> i32 {
    %c0_i32 = arith.constant 0 : i32
    %c0_i32_0 = arith.constant 0 : i32
    return %c0_i32 : i32
  }
  func.func @transform_1(%arg0: i32) -> (i32, i32) {
    %c0_i32 = arith.constant 0 : i32
    %c0_i32_0 = arith.constant 0 : i32
    return %arg0, %c0_i32 : i32, i32
  }
  func.func @transform_2(%arg0: i32) -> (i32, i32) {
    %c0_i32 = arith.constant 0 : i32
    %c0_i32_0 = arith.constant 0 : i32
    return %arg0, %c0_i32 : i32, i32
  }
  func.func @transform_3(%arg0: i32) -> (i32, i32) {
    %c0_i32 = arith.constant 0 : i32
    %c0_i32_0 = arith.constant 0 : i32
    return %arg0, %c0_i32 : i32, i32
  }
}

</mosaic_0001>

<bundles_post_ra>
// kernel: policy_forward.1
= control target key start
LH: loop header
LB: loop body
LE: loop exit
PB: predicated region body
PF: predicated region fallthrough
CT: control target
= control target key end

     0   :  { %9 = vsyncpa [#allocation4], 0  ;;  %s136_s0 = inlined_call_operand.vmem [shape: f32[4], index: 0, kind: input, shape index: {}]   ;;  %s137_s1 = inlined_call_operand.vmem [shape: f32[2,128], index: 1, kind: input, shape index: {}, may-alias: {1,2}]   ;;  %s138_s2 = inlined_call_operand.vmem [shape: f32[2,128], index: 2, kind: output, shape index: {0}, may-alias: {1,2}]   ;;  %s139_s3 = inlined_call_operand.hbm [shape: f32[2,128], index: 3, kind: output, shape index: {1}]  }
   0x1   :  { %10 = vsyncpa [#allocation3], 0  ;;  %s17_s14 = sshll.u32 %s136_s0, 4  ;;  %s18_s14 = int_to_ptr.vmem [resolvable:$true] %s17_s14 }
   0x2   :  { %s66_s15 = scalar_lea.vmem %s18_s14, 16  ;;  %p71_p1 = scmp.lt.s32.totalorder %s18_s14, %s18_s14 }
   0x3   :  { %p67_p0 = scmp.ne.s32.totalorder %s18_s14, %s66_s15  ;;  %p72_p2 = scmp.lt.s32.totalorder %s66_s15, %s66_s15 }
   0x5   :  { %p73_p3 = por %p72_p2, %p71_p1 }
   0x7   :  { %p74_p4 = pnand %p73_p3, %p67_p0 }
   0x9   :  { %77 = shalt.err (!%p74_p4)
}
   0xa   :  { %s102_s16 = smov [#allocation2]  }
   0xb   :  { %20 = dma.vmem_to_smem %s18_s14, 16, %s102_s16, [#allocation4]  }
   0xc   :  { %98 = dma.done.wait [#allocation4], 16  }
   0xd   :  { %99 = vsyncadd [#allocation4], 4294967280 }
   0xe   :  { %26 = sfence }
   0xf   :  { %s62_s17 = sld [smem:[#allocation2 + $0x1]]  ;;  %v27_v0 = vld [vmem:[%s137_s1] sm:$0x3]  ;;  %s103_s0 = smov [#allocation5]  }
  0x10   :  { %s63_s18 = sld [smem:[#allocation2 + $0x3]]  ;;  %s50_s23 = sshll.u32 %s103_s0, 4  ;;  %s51_s23 = int_to_ptr.vmem [resolvable:$true] %s50_s23 }
  0x11   :  { %s28_s19 = sld [smem:[#allocation2]]  ;;  %s78_s24 = scalar_lea.vmem %s51_s23, 32 }
  0x12   :  { %s61_s20 = sld [smem:[#allocation2 + $0x2]]  ;;  %p79_p5 = scmp.ne.s32.totalorder %s51_s23, %s78_s24 }
  0x13   :  { %p83_p6 = scmp.lt.s32.totalorder %s51_s23, %s51_s23  ;;  %p84_p7 = scmp.lt.s32.totalorder %s78_s24, %s78_s24 }
  0x15   :  { %v36_v1 = vstv %s62_s17  ;;  %p85_p8 = por %p84_p7, %p83_p6 }
  0x16   :  { %v37_v2 = vmul.f32 %v36_v1, %v27_v0  ;;  %v39_v3 = vstv %s63_s18 }
  0x17   :  { %v29_v4 = vstv %s28_s19  ;;  %p86_p9 = pnand %p85_p8, %p79_p5 }
  0x18   :  { %v40_v5 = vadd.f32 %v39_v3, %v37_v2  ;;  %v30_v6 = vmul.f32 %v29_v4, %v27_v0  ;;  %v32_v7 = vstv %s61_s20 }
  0x1a   :  { %41 = vst [vmem:[#allocation5] sm:$0x3] %v40_v5  ;;  %v33_v8 = vadd.f32 %v32_v7, %v30_v6 }
  0x1b   :  { %89 = shalt.err (!%p86_p9)
}
  0x1c   :  { %53 = dma.vmem_to_hbm [thread:$0]  %s51_s23, 32, %s139_s3, [#allocation3]   ;;  %34 = vst [vmem:[%s138_s2] sm:$0x3] %v33_v8 }
  0x1d   :  { %100 = dma.done.wait [#allocation3], 32  }
  0x1e   :  { %101 = vsyncadd [#allocation3], 4294967264 }
  0x1f   :  { %59 = vsyncpa [#allocation3], 1 }
  0x20   :  { %60 = vsyncpa [#allocation4], 1 }

</bundles_post_ra>
